<compile_context>
chip_gen: v7x
topology: tpu7x:2x2x1
jax: 0.10.0
libtpu: 0.0.40
codegen_flags: <defaults>
</compile_context>

<pallas_src>
import math
import functools
import numpy as np
import jax
import jax.numpy as jnp
from jax.experimental import pallas as pl
from jax.experimental.pallas import tpu as pltpu


# ----------------------------- config ("AudioArguments") ---------------------
SR = 16000
N_FFT = 256
HOP = 128
N_MELS = 64
FMIN = 50.0
FMAX = 7600.0
CENTER = True
TOP_DB = 80.0
AMIN = 1e-10
BN_EPS = 1e-5

N_FREQ = N_FFT // 2 + 1            # 129 rfft bins
N_KEEP = 128                       # kept bins (bins >= FMAX carry zero mel weight)
PACK_W = 2 * N_MELS                # 128: two frames' mels packed per lane row
MAX_PACK_TILE = 512                # packed rows per grid step (= 1024 frames)

# BatchNorm2d(n_mels) after init_bn(): gamma=1, beta=0, mean=0, var=1
BN_SCALE = 1.0 / math.sqrt(1.0 + BN_EPS)
BN_BIAS = 0.0                      # exactly zero -> folded out of the kernel
LOG_COEF = 10.0 * BN_SCALE / math.log(10.0)   # 10*log10(.) * bn_scale via natural log

assert N_FFT == 2 * HOP, "strided frame construction assumes 50% overlap"


def _round_up(x, m):
    return ((x + m - 1) // m) * m


def _cdiv(a, b):
    return -(-a // b)


# ----------------------------- glue: mel filterbank (slaney/slaney) ----------
def _hz_to_mel_slaney(f):
    f = np.asarray(f, dtype=np.float64)
    f_sp = 200.0 / 3.0
    mels = f / f_sp
    min_log_hz = 1000.0
    min_log_mel = min_log_hz / f_sp
    logstep = math.log(6.4) / 27.0
    return np.where(f >= min_log_hz,
                    min_log_mel + np.log(np.maximum(f, min_log_hz) / min_log_hz) / logstep,
                    mels)


def _mel_to_hz_slaney(m):
    m = np.asarray(m, dtype=np.float64)
    f_sp = 200.0 / 3.0
    freqs = m * f_sp
    min_log_hz = 1000.0
    min_log_mel = min_log_hz / f_sp
    logstep = math.log(6.4) / 27.0
    return np.where(m >= min_log_mel,
                    min_log_hz * np.exp(logstep * (m - min_log_mel)),
                    freqs)


def melscale_fbanks_slaney(n_freqs, f_min, f_max, n_mels, sample_rate):
    all_freqs = np.linspace(0.0, sample_rate / 2.0, n_freqs)
    m_pts = np.linspace(_hz_to_mel_slaney(f_min), _hz_to_mel_slaney(f_max), n_mels + 2)
    f_pts = _mel_to_hz_slaney(m_pts)
    f_diff = f_pts[1:] - f_pts[:-1]
    slopes = f_pts[None, :] - all_freqs[:, None]
    down = -slopes[:, :-2] / f_diff[:-1]
    up = slopes[:, 2:] / f_diff[1:]
    fb = np.maximum(0.0, np.minimum(down, up))
    enorm = 2.0 / (f_pts[2:n_mels + 2] - f_pts[:n_mels])           # slaney norm
    fb = fb * enorm[None, :]
    return fb.astype(np.float32)


# ----------------------------- constants (built once at import) ---------------
def _build_constants():
    n = np.arange(N_FFT)
    window = 0.5 - 0.5 * np.cos(2.0 * np.pi * n / N_FFT)            # periodic Hann
    k = np.arange(N_KEEP)                                           # kept freq bins 0..127
    ang = 2.0 * np.pi * np.outer(n, k) / N_FFT                      # (n_fft, 128)
    dft = np.concatenate([np.cos(ang), np.sin(ang)], axis=1)        # (n_fft, 256) = [cos|sin]
    dft = (window[:, None] * dft).astype(np.float32)                # window folded in

    fb = melscale_fbanks_slaney(N_FREQ, FMIN, FMAX, N_MELS, SR)     # (129, 64)
    fb128 = fb[:N_KEEP, :]                                          # dropped rows have 0 weight
    mel_a = np.zeros((N_KEEP, PACK_W), np.float32)                  # even frame -> lanes 0..63
    mel_a[:, :N_MELS] = fb128
    mel_b = np.zeros((N_KEEP, PACK_W), np.float32)                  # odd frame  -> lanes 64..127
    mel_b[:, N_MELS:] = fb128
    return dft, mel_a, mel_b


_CONSTS = _build_constants()


# ----------------------------- Pallas kernel ---------------------------------
def melspec_db_bn_kernel(fr2_ref, dft_ref, mel_a_ref, mel_b_ref, y_ref, max_ref, *, n_valid):
    """fr2: (tmp, 2*n_fft) = [even frame | odd frame] per row.
    dft: (n_fft, 256) windowed [cos|sin].  mel_a/mel_b: (128, 128) packed mel filterbanks.
    y: (tmp, 128) packed BN-scaled log-mel-dB.  max: (8, 128) masked per-tile max."""
    # DFT of both frames of the pair (each (tmp, 256) @ (256, 256) on the MXU)
    d0 = jnp.dot(fr2_ref[:, :N_FFT], dft_ref[...], preferred_element_type=jnp.float32)
    d1 = jnp.dot(fr2_ref[:, N_FFT:], dft_ref[...], preferred_element_type=jnp.float32)
    # power spectra (lane-aligned 128-wide halves of the fused cos|sin result)
    pw_e = d0[:, :N_KEEP] * d0[:, :N_KEEP] + d0[:, N_KEEP:] * d0[:, N_KEEP:]
    pw_o = d1[:, :N_KEEP] * d1[:, :N_KEEP] + d1[:, N_KEEP:] * d1[:, N_KEEP:]
    # packed mel projection: lanes 0..63 = even frame, 64..127 = odd frame
    mel = (jnp.dot(pw_e, mel_a_ref[...], preferred_element_type=jnp.float32) +
           jnp.dot(pw_o, mel_b_ref[...], preferred_element_type=jnp.float32))
    # AmplitudeToDB (power, ref=1.0) with the BatchNorm scale folded in (bias = 0)
    y = LOG_COEF * jnp.log(jnp.maximum(mel, AMIN))
    y_ref[...] = y

    # masked per-tile max for the top_db floor: exclude zero-padded (non-existent) frames
    tmp = y.shape[0]
    row = jax.lax.broadcasted_iota(jnp.int32, (tmp, PACK_W), 0) + pl.program_id(0) * tmp
    lane = jax.lax.broadcasted_iota(jnp.int32, (tmp, PACK_W), 1)
    frame_idx = 2 * row + (lane >= N_MELS).astype(jnp.int32)
    y_masked = jnp.where(frame_idx < n_valid, y, -jnp.inf)
    max_ref[...] = jnp.broadcast_to(jnp.max(y_masked, axis=0, keepdims=True), (8, PACK_W))


# ----------------------------- wrapper ----------------------------------------
def _frame_audio(x):
    """(B, L) f32 -> (B*T, n_fft) frames via strided slices (no gather). Returns (frames, T)."""
    B = x.shape[0]
    if CENTER:
        x = jnp.pad(x, ((0, 0), (N_FFT // 2, N_FFT // 2)), mode="reflect")
    Lp = x.shape[1]
    T = 1 + (Lp - N_FFT) // HOP
    needed = (T + 1) * HOP                                          # = (T-1)*HOP + N_FFT
    chunks = x[:, :needed].reshape(B, T + 1, HOP)
    frames = jnp.concatenate([chunks[:, :T, :], chunks[:, 1:, :]], axis=-1)   # (B, T, n_fft)
    return frames.reshape(B * T, N_FFT).astype(jnp.float32), T


@jax.jit
def sample_model_forward(x):
    """x: (B, L) float32 audio. Returns preprocess() output of shape (B, 1, T, n_mels)."""
    B, _ = x.shape
    frames, T = _frame_audio(x)
    N = B * T                                   # valid frames
    NP = (N + 1) // 2                           # packed rows needed (2 frames / row)

    # adaptive tile: <= MAX_PACK_TILE packed rows per step, >= 2 steps when possible (v7x 2-TC)
    target_tiles = max(2, _cdiv(NP, MAX_PACK_TILE))
    tmp = _round_up(_cdiv(NP, target_tiles), 8)
    num_tiles = _cdiv(NP, tmp)
    n_pack = num_tiles * tmp

    frames = jnp.pad(frames, ((0, 2 * n_pack - N), (0, 0)))
    frames2 = frames.reshape(n_pack, 2 * N_FFT)        # free view: [frame 2r | frame 2r+1]

    dft, mel_a, mel_b = (jnp.asarray(c) for c in _CONSTS)

    y_packed, tile_max = pl.pallas_call(
        functools.partial(melspec_db_bn_kernel, n_valid=N),
        out_shape=(jax.ShapeDtypeStruct((n_pack, PACK_W), jnp.float32),
                   jax.ShapeDtypeStruct((num_tiles * 8, PACK_W), jnp.float32)),
        grid=(num_tiles,),
        in_specs=[
            pl.BlockSpec((tmp, 2 * N_FFT), lambda i: (i, 0)),       # paired frames
            pl.BlockSpec((N_FFT, 2 * N_KEEP), lambda i: (0, 0)),    # fused windowed [cos|sin]
            pl.BlockSpec((N_KEEP, PACK_W), lambda i: (0, 0)),       # mel (even-frame lanes)
            pl.BlockSpec((N_KEEP, PACK_W), lambda i: (0, 0)),       # mel (odd-frame lanes)
        ],
        out_specs=(pl.BlockSpec((tmp, PACK_W), lambda i: (i, 0)),
                   pl.BlockSpec((8, PACK_W), lambda i: (i, 0))),
        compiler_params=pltpu.CompilerParams(
            dimension_semantics=("parallel",),
            vmem_limit_bytes=32 * 1024 * 1024),
    )(frames2, dft, mel_a, mel_b)

    # top_db floor (global max over batch, see TODO) — tiny reduction over per-tile maxes.
    floor = jnp.max(tile_max) - TOP_DB * BN_SCALE

    # Unpack (bit-identical reshape), drop padding; XLA fuses the clamp into this copy.
    y = y_packed.reshape(2 * n_pack, N_MELS)[:N]
    out = jnp.maximum(y, floor).reshape(B, T, N_MELS)
    return out[:, None, :, :]                                       # (B, 1, T, n_mels)


if __name__ == "__main__":
    key = jax.random.PRNGKey(0)
    B, L = 2, 2048
    audio = jax.random.normal(key, (B, L), dtype=jnp.float32)

    y = sample_model_forward(audio)
    jax.block_until_ready(y)
    assert y.shape == (B, 1, 1 + L // HOP, N_MELS), y.shape
    assert bool(jnp.all(jnp.isfinite(y)))
    print("KERNEL_OK")
</pallas_src>

<mosaic_0001>
module attributes {stable_mosaic.version = 11 : i64} {
  func.func @melspec_db_bn_kernel(%arg0: i32, %arg1: memref<16x512xf32, #tpu.memory_space<vmem>>, %arg2: memref<256x256xf32, #tpu.memory_space<vmem>>, %arg3: memref<128x128xf32, #tpu.memory_space<vmem>>, %arg4: memref<128x128xf32, #tpu.memory_space<vmem>>, %arg5: memref<16x128xf32, #tpu.memory_space<vmem>>, %arg6: memref<8x128xf32, #tpu.memory_space<vmem>>) attributes {dimension_semantics = [#tpu.dimension_semantics<parallel>], iteration_bounds = array<i64: 2>, scalar_prefetch = 0 : i64, scratch_operands = 0 : i64, tpu.core_type = #tpu.core_type<tc>, window_params = [{transform_indices = @transform_0, window_bounds = array<i64: 16, 512>}, {pipeline_mode = #tpu.pipeline_mode<synchronous>, transform_indices = @transform_1, window_bounds = array<i64: 256, 256>}, {pipeline_mode = #tpu.pipeline_mode<synchronous>, transform_indices = @transform_2, window_bounds = array<i64: 128, 128>}, {pipeline_mode = #tpu.pipeline_mode<synchronous>, transform_indices = @transform_3, window_bounds = array<i64: 128, 128>}, {transform_indices = @transform_4, window_bounds = array<i64: 16, 128>}, {transform_indices = @transform_5, window_bounds = array<i64: 8, 128>}]} {
    %c0 = arith.constant 0 : index
    %c0_0 = arith.constant 0 : index
    %0 = vector.load %arg1[%c0, %c0_0] : memref<16x512xf32, #tpu.memory_space<vmem>>, vector<16x256xf32>
    %c0_1 = arith.constant 0 : index
    %c0_2 = arith.constant 0 : index
    %1 = vector.load %arg2[%c0_1, %c0_2] : memref<256x256xf32, #tpu.memory_space<vmem>>, vector<256x256xf32>
    %cst = arith.constant dense<0.000000e+00> : vector<16x256xf32>
    %2 = tpu.matmul %0, %1, %cst {dimension_numbers = #tpu.dot_dimension_numbers<[1], [0], [0], [1], [0, 0, 1, 1], [], []>} : vector<16x256xf32>, vector<256x256xf32>, vector<16x256xf32> -> vector<16x256xf32>
    %c0_3 = arith.constant 0 : index
    %c256 = arith.constant 256 : index
    %3 = vector.load %arg1[%c0_3, %c256] : memref<16x512xf32, #tpu.memory_space<vmem>>, vector<16x256xf32>
    %c0_4 = arith.constant 0 : index
    %c0_5 = arith.constant 0 : index
    %4 = vector.load %arg2[%c0_4, %c0_5] : memref<256x256xf32, #tpu.memory_space<vmem>>, vector<256x256xf32>
    %cst_6 = arith.constant dense<0.000000e+00> : vector<16x256xf32>
    %5 = tpu.matmul %3, %4, %cst_6 {dimension_numbers = #tpu.dot_dimension_numbers<[1], [0], [0], [1], [0, 0, 1, 1], [], []>} : vector<16x256xf32>, vector<256x256xf32>, vector<16x256xf32> -> vector<16x256xf32>
    %6 = vector.extract_strided_slice %2 {offsets = [0, 0], sizes = [16, 128], strides = [1, 1]} : vector<16x256xf32> to vector<16x128xf32>
    %7 = vector.extract_strided_slice %2 {offsets = [0, 0], sizes = [16, 128], strides = [1, 1]} : vector<16x256xf32> to vector<16x128xf32>
    %8 = arith.mulf %6, %7 : vector<16x128xf32>
    %9 = vector.extract_strided_slice %2 {offsets = [0, 128], sizes = [16, 128], strides = [1, 1]} : vector<16x256xf32> to vector<16x128xf32>
    %10 = vector.extract_strided_slice %2 {offsets = [0, 128], sizes = [16, 128], strides = [1, 1]} : vector<16x256xf32> to vector<16x128xf32>
    %11 = arith.mulf %9, %10 : vector<16x128xf32>
    %12 = arith.addf %8, %11 : vector<16x128xf32>
    %13 = vector.extract_strided_slice %5 {offsets = [0, 0], sizes = [16, 128], strides = [1, 1]} : vector<16x256xf32> to vector<16x128xf32>
    %14 = vector.extract_strided_slice %5 {offsets = [0, 0], sizes = [16, 128], strides = [1, 1]} : vector<16x256xf32> to vector<16x128xf32>
    %15 = arith.mulf %13, %14 : vector<16x128xf32>
    %16 = vector.extract_strided_slice %5 {offsets = [0, 128], sizes = [16, 128], strides = [1, 1]} : vector<16x256xf32> to vector<16x128xf32>
    %17 = vector.extract_strided_slice %5 {offsets = [0, 128], sizes = [16, 128], strides = [1, 1]} : vector<16x256xf32> to vector<16x128xf32>
    %18 = arith.mulf %16, %17 : vector<16x128xf32>
    %19 = arith.addf %15, %18 : vector<16x128xf32>
    %c0_7 = arith.constant 0 : index
    %c0_8 = arith.constant 0 : index
    %20 = vector.load %arg3[%c0_7, %c0_8] : memref<128x128xf32, #tpu.memory_space<vmem>>, vector<128x128xf32>
    %cst_9 = arith.constant dense<0.000000e+00> : vector<16x128xf32>
    %21 = tpu.matmul %12, %20, %cst_9 {dimension_numbers = #tpu.dot_dimension_numbers<[1], [0], [0], [1], [0, 0, 1, 1], [], []>} : vector<16x128xf32>, vector<128x128xf32>, vector<16x128xf32> -> vector<16x128xf32>
    %c0_10 = arith.constant 0 : index
    %c0_11 = arith.constant 0 : index
    %22 = vector.load %arg4[%c0_10, %c0_11] : memref<128x128xf32, #tpu.memory_space<vmem>>, vector<128x128xf32>
    %cst_12 = arith.constant dense<0.000000e+00> : vector<16x128xf32>
    %23 = tpu.matmul %19, %22, %cst_12 {dimension_numbers = #tpu.dot_dimension_numbers<[1], [0], [0], [1], [0, 0, 1, 1], [], []>} : vector<16x128xf32>, vector<128x128xf32>, vector<16x128xf32> -> vector<16x128xf32>
    %24 = arith.addf %21, %23 : vector<16x128xf32>
    %cst_13 = arith.constant 1.000000e-10 : f32
    %25 = vector.broadcast %cst_13 : f32 to vector<16x128xf32>
    %26 = arith.maximumf %24, %25 : vector<16x128xf32>
    %27 = math.log %26 : vector<16x128xf32>
    %cst_14 = arith.constant 4.34292316 : f32
    %28 = vector.broadcast %cst_14 : f32 to vector<16x128xf32>
    %29 = arith.mulf %28, %27 : vector<16x128xf32>
    %c0_15 = arith.constant 0 : index
    %c0_16 = arith.constant 0 : index
    %30 = vector.load %arg5[%c0_15, %c0_16] : memref<16x128xf32, #tpu.memory_space<vmem>>, vector<16x128xf32>
    tpu.vector_store %arg5[%c0_15, %c0_16], %29 {strides = array<i32>} : memref<16x128xf32, #tpu.memory_space<vmem>>, vector<16x128xf32>,
    %31 = tpu.iota {dimensions = array<i32: 0>} : vector<16x128xi32>
    %c16_i32 = arith.constant 16 : i32
    %32 = arith.muli %arg0, %c16_i32 : i32
    %33 = vector.broadcast %32 : i32 to vector<16x128xi32>
    %34 = arith.addi %31, %33 : vector<16x128xi32>
    %35 = tpu.iota {dimensions = array<i32: 1>} : vector<16x128xi32>
    %c2_i32 = arith.constant 2 : i32
    %36 = vector.broadcast %c2_i32 : i32 to vector<16x128xi32>
    %37 = arith.muli %36, %34 : vector<16x128xi32>
    %c64_i32 = arith.constant 64 : i32
    %38 = vector.broadcast %c64_i32 : i32 to vector<16x128xi32>
    %39 = arith.cmpi sge, %35, %38 : vector<16x128xi32>
    %40 = arith.extui %39 : vector<16x128xi1> to vector<16x128xi32>
    %41 = arith.addi %37, %40 : vector<16x128xi32>
    %c34_i32 = arith.constant 34 : i32
    %42 = vector.broadcast %c34_i32 : i32 to vector<16x128xi32>
    %43 = arith.cmpi slt, %41, %42 : vector<16x128xi32>
    %cst_17 = arith.constant 0xFF800000 : f32
    %44 = vector.broadcast %cst_17 : f32 to vector<16x128xf32>
    %45 = arith.select %43, %29, %44 : vector<16x128xi1>, vector<16x128xf32>
    %cst_18 = arith.constant dense<0xFF800000> : vector<128xf32>
    %46 = vector.multi_reduction <maximumf>, %45, %cst_18 [0] : vector<16x128xf32> to vector<128xf32>
    %47 = vector.shape_cast %46 : vector<128xf32> to vector<1x128xf32>
    %48 = vector.shape_cast %47 : vector<1x128xf32> to vector<1x128xf32>
    %49 = vector.broadcast %48 : vector<1x128xf32> to vector<8x128xf32>
    %c0_19 = arith.constant 0 : index
    %c0_20 = arith.constant 0 : index
    %50 = vector.load %arg6[%c0_19, %c0_20] : memref<8x128xf32, #tpu.memory_space<vmem>>, vector<8x128xf32>
    tpu.vector_store %arg6[%c0_19, %c0_20], %49 {strides = array<i32>} : memref<8x128xf32, #tpu.memory_space<vmem>>, vector<8x128xf32>,
    return
  }
  func.func @transform_0(%arg0: i32) -> (i32, i32) {
    %c0_i32 = arith.constant 0 : i32
    %c0_i32_0 = arith.constant 0 : i32
    return %arg0, %c0_i32 : i32, i32
  }
  func.func @transform_1(%arg0: i32) -> (i32, i32) {
    %c0_i32 = arith.constant 0 : i32
    %c0_i32_0 = arith.constant 0 : i32
    %c0_i32_1 = arith.constant 0 : i32
    return %c0_i32, %c0_i32_0 : i32, i32
  }
  func.func @transform_2(%arg0: i32) -> (i32, i32) {
    %c0_i32 = arith.constant 0 : i32
    %c0_i32_0 = arith.constant 0 : i32
    %c0_i32_1 = arith.constant 0 : i32
    return %c0_i32, %c0_i32_0 : i32, i32
  }
  func.func @transform_3(%arg0: i32) -> (i32, i32) {
    %c0_i32 = arith.constant 0 : i32
    %c0_i32_0 = arith.constant 0 : i32
    %c0_i32_1 = arith.constant 0 : i32
    return %c0_i32, %c0_i32_0 : i32, i32
  }
  func.func @transform_4(%arg0: i32) -> (i32, i32) {
    %c0_i32 = arith.constant 0 : i32
    %c0_i32_0 = arith.constant 0 : i32
    return %arg0, %c0_i32 : i32, i32
  }
  func.func @transform_5(%arg0: i32) -> (i32, i32) {
    %c0_i32 = arith.constant 0 : i32
    %c0_i32_0 = arith.constant 0 : i32
    return %arg0, %c0_i32 : i32, i32
  }
}

</mosaic_0001>

<bundles_post_ra>
// kernel: sample_model_forward.1
= control target key start
LH: loop header
LB: loop body
LE: loop exit
PB: predicated region body
PF: predicated region fallthrough
CT: control target
= control target key end

     0   :  { %s1153_s18 = smov 0   ;;  %s1481_s0 = inlined_call_operand.vmem [shape: f32[32,512], index: 0, kind: input, shape index: {}]   ;;  %s1482_s1 = inlined_call_operand.vmem [shape: f32[256,256], index: 1, kind: input, shape index: {}]   ;;  %s1483_s2 = inlined_call_operand.vmem [shape: f32[128,128], index: 2, kind: input, shape index: {}]   ;;  %s1484_s3 = inlined_call_operand.vmem [shape: f32[128,128], index: 3, kind: input, shape index: {}]   ;;  %s1485_s4 = inlined_call_operand.vmem [shape: f32[32,128], index: 4, kind: output, shape index: {0}]   ;;  %s1486_s5 = inlined_call_operand.vmem [shape: f32[16,128], index: 5, kind: output, shape index: {1}]  }
   0x1 LB: > { %s1159_s19 = sadd.s32 4294967295, %s1120_s18   ;;  %p790_p0 = scmp.ge.s32.totalorder %s1120_s18, 1  ;;  %s1120_s18 = sphi %s1153_s18, %s16_s18  }
   0x2   : > { %p192_p1 = scmp.lt.s32.totalorder %s1120_s18, 3 }
   0x4   : > { %p193_p2 = pnand %p790_p0, %p192_p1 }
   0x5   : > { %v247_v0 = vld [vmem:[%s1482_s1 + $0x8] sm:$0xff] (!%p193_p2)  ;;  %v249_v1 = vld [vmem:[%s1482_s1 + $0x18] sm:$0xff] (!%p193_p2)  ;;  %v246_v2 = vld [vmem:[%s1482_s1] sm:$0xff] (!%p193_p2)  ;;  %s791_s15 = sshll.u32 (!%p193_p2), %s1159_s19, 1  ;;  %s797_s22 = sshll.u32 (!%p193_p2), %s1159_s19, 4 }
   0x6   : > { %196 = sbr.rel (%p193_p2) target bundleno = 541 (0x21d), region = 36  ;;  %v907_v3 = vpack.c.bf16 (!%p193_p2), %v249_v1, %v247_v0  ;;  %v248_v4 = vld [vmem:[%s1482_s1 + $0x10] sm:$0xff] (!%p193_p2)  ;;  %v251_v5 = vld [vmem:[%s1482_s1 + $0x28] sm:$0xff] (!%p193_p2)  ;;  %v253_v6 = vld [vmem:[%s1482_s1 + $0x38] sm:$0xff] (!%p193_p2)  ;;  %p226_p3 = scmp.lt.s32.totalorder (!%p193_p2), %s791_s15, 3 }
   0x7   : > { %v909_v7 = vpack.c.bf16 (!%p193_p2), %v248_v4, %v246_v2  ;;  %v911_v8 = vpack.c.bf16 (!%p193_p2), %v253_v6, %v251_v5  ;;  %v250_v9 = vld [vmem:[%s1482_s1 + $0x20] sm:$0xff] (!%p193_p2)  ;;  %v252_v10 = vld [vmem:[%s1482_s1 + $0x30] sm:$0xff] (!%p193_p2)  ;;  %v255_v11 = vld [vmem:[%s1482_s1 + $0x48] sm:$0xff] (!%p193_p2)  ;;  %p238_p4 = scmp.lt.s32.totalorder (!%p193_p2), %s1159_s19, 1 }
   0x8   : > { %908 = vmatprep.subr.bf16.mxu0 (!%p193_p2), %v907_v3  ;;  %972 = vmatprep.subr.bf16.mxu1 (!%p193_p2), %v907_v3  ;;  %v257_v12 = vld [vmem:[%s1482_s1 + $0x58] sm:$0xff] (!%p193_p2)  ;;  %v913_v13 = vpack.c.bf16 (!%p193_p2), %v252_v10, %v250_v9  ;;  %v254_v15 = vld [vmem:[%s1482_s1 + $0x40] sm:$0xff] (!%p193_p2)  ;;  %v256_v16 = vld [vmem:[%s1482_s1 + $0x50] sm:$0xff] (!%p193_p2) }
   0x9   : > { %910 = vmatpush1.bf16.msra.mxu0 (!%p193_p2), %v909_v7  ;;  %974 = vmatpush1.bf16.msra.mxu1 (!%p193_p2), %v909_v7  ;;  %v915_v14 = vpack.c.bf16 (!%p193_p2), %v257_v12, %v255_v11  ;;  %v259_v17 = vld [vmem:[%s1482_s1 + $0x68] sm:$0xff] (!%p193_p2)  ;;  %v261_v18 = vld [vmem:[%s1482_s1 + $0x78] sm:$0xff] (!%p193_p2)  ;;  %v917_v19 = vpack.c.bf16 (!%p193_p2), %v256_v16, %v254_v15  ;;  %v258_v21 = vld [vmem:[%s1482_s1 + $0x60] sm:$0xff] (!%p193_p2) }
   0xa   : > { %912 = vmatprep.subr.bf16.mxu0 (!%p193_p2), %v911_v8  ;;  %976 = vmatprep.subr.bf16.mxu1 (!%p193_p2), %v911_v8  ;;  %v919_v20 = vpack.c.bf16 (!%p193_p2), %v261_v18, %v259_v17  ;;  %v260_v22 = vld [vmem:[%s1482_s1 + $0x70] sm:$0xff] (!%p193_p2)  ;;  %v263_v23 = vld [vmem:[%s1482_s1 + $0x88] sm:$0xff] (!%p193_p2)  ;;  %v265_v24 = vld [vmem:[%s1482_s1 + $0x98] sm:$0xff] (!%p193_p2) }
   0xb   : > { %v921_v25 = vpack.c.bf16 (!%p193_p2), %v260_v22, %v258_v21  ;;  %v923_v26 = vpack.c.bf16 (!%p193_p2), %v265_v24, %v263_v23  ;;  %v262_v27 = vld [vmem:[%s1482_s1 + $0x80] sm:$0xff] (!%p193_p2)  ;;  %v264_v28 = vld [vmem:[%s1482_s1 + $0x90] sm:$0xff] (!%p193_p2)  ;;  %v267_v29 = vld [vmem:[%s1482_s1 + $0xa8] sm:$0xff] (!%p193_p2) }
   0xc   : > { %v269_v30 = vld [vmem:[%s1482_s1 + $0xb8] sm:$0xff] (!%p193_p2)  ;;  %v925_v31 = vpack.c.bf16 (!%p193_p2), %v264_v28, %v262_v27  ;;  %v266_v33 = vld [vmem:[%s1482_s1 + $0xa0] sm:$0xff] (!%p193_p2)  ;;  %v268_v34 = vld [vmem:[%s1482_s1 + $0xb0] sm:$0xff] (!%p193_p2) }
   0xd   : > { %914 = vmatpush1.bf16.msra.mxu0 %v913_v13  ;;  %978 = vmatpush1.bf16.msra.mxu1 %v913_v13  ;;  %s1488_s15 = smov (!%p226_p3, %s791_s15), 3  ;;  %v927_v32 = vpack.c.bf16 %v269_v30, %v267_v29  ;;  %v271_v35 = vld [vmem:[%s1482_s1 + $0xc8] sm:$0xff]  ;;  %v273_v36 = vld [vmem:[%s1482_s1 + $0xd8] sm:$0xff]  ;;  %v929_v37 = vpack.c.bf16 %v268_v34, %v266_v33  ;;  %v270_v38 = vld [vmem:[%s1482_s1 + $0xc0] sm:$0xff]  ;;  %s1490_s19 = smov (!%p238_p4, %s1159_s19), 1 }
   0xe   : > { %916 = vmatprep.subr.bf16.mxu0 %v915_v14  ;;  %980 = vmatprep.subr.bf16.mxu1 %v915_v14  ;;  %s800_s20 = sshll.u32 %s1488_s15, 5  ;;  %v931_v39 = vpack.c.bf16 %v273_v36, %v271_v35  ;;  %v272_v40 = vld [vmem:[%s1482_s1 + $0xd0] sm:$0xff]  ;;  %v275_v43 = vld [vmem:[%s1482_s1 + $0xe8] sm:$0xff]  ;;  %v277_v44 = vld [vmem:[%s1482_s1 + $0xf8] sm:$0xff]  ;;  %s795_s23 = sshll.u32 %s1488_s15, 3 }
   0xf   : > { %s1248_s6 = scalar_lea.vmem %s1481_s0, %s800_s20  ;;  %v933_v45 = vpack.c.bf16 %v272_v40, %v270_v38  ;;  %v935_v46 = vpack.c.bf16 %v277_v44, %v275_v43  ;;  %v274_v47 = vld [vmem:[%s1482_s1 + $0xe0] sm:$0xff]  ;;  %v276_v48 = vld [vmem:[%s1482_s1 + $0xf0] sm:$0xff]  ;;  %v279_v49 = vld [vmem:[%s1482_s1 + $0x108] sm:$0xff]  ;;  %s236_s26 = scalar_lea.vmem %s1485_s4, %s795_s23 }
  0x10   : > { %v243_v41 = vld [vmem:[%s1248_s6 + $0x8] sm:$0xff]  ;;  %v388_v42 = vld [vmem:[%s1248_s6 + $0x18] sm:$0xff]  ;;  %v937_v51 = vpack.c.bf16 %v276_v48, %v274_v47  ;;  %v278_v53 = vld [vmem:[%s1482_s1 + $0x100] sm:$0xff]  ;;  %s796_s15 = sshll.u32 %s1490_s19, 3 }
  0x11   : > { %918 = vmatpush1.bf16.msra.mxu0 %v917_v19  ;;  %982 = vmatpush1.bf16.msra.mxu1 %v917_v19  ;;  %v281_v50 = vld [vmem:[%s1482_s1 + $0x118] sm:$0xff]  ;;  %v280_v54 = vld [vmem:[%s1482_s1 + $0x110] sm:$0xff]  ;;  %v283_v55 = vld [vmem:[%s1482_s1 + $0x128] sm:$0xff]  ;;  %s241_s29 = scalar_lea.vmem %s1486_s5, %s796_s15 }
  0x12   : > { %920 = vmatprep.subr.bf16.mxu0 %v919_v20  ;;  %984 = vmatprep.subr.bf16.mxu1 %v919_v20  ;;  %v939_v52 = vpack.c.bf16 %v281_v50, %v279_v49  ;;  %v285_v56 = vld [vmem:[%s1482_s1 + $0x138] sm:$0xff]  ;;  %v941_v57 = vpack.c.bf16 %v280_v54, %v278_v53  ;;  %v282_v59 = vld [vmem:[%s1482_s1 + $0x120] sm:$0xff]  ;;  %v284_v60 = vld [vmem:[%s1482_s1 + $0x130] sm:$0xff] }
  0x13   : > { %374 = vmatprep.mubr.f32.mxu0 %v243_v41  ;;  %455 = vmatprep.mubr.f32.mxu1 %v388_v42  ;;  %v943_v58 = vpack.c.bf16 %v285_v56, %v283_v55  ;;  %v287_v61 = vld [vmem:[%s1482_s1 + $0x148] sm:$0xff]  ;;  %v289_v62 = vld [vmem:[%s1482_s1 + $0x158] sm:$0xff]  ;;  %v945_v63 = vpack.c.bf16 %v284_v60, %v282_v59  ;;  %v286_v1 = vld [vmem:[%s1482_s1 + $0x140] sm:$0xff] }
  0x14   : > { %v947_v0 = vpack.c.bf16 %v289_v62, %v287_v61  ;;  %v288_v2 = vld [vmem:[%s1482_s1 + $0x150] sm:$0xff]  ;;  %v291_v3 = vld [vmem:[%s1482_s1 + $0x168] sm:$0xff]  ;;  %v293_v4 = vld [vmem:[%s1482_s1 + $0x178] sm:$0xff] }
  0x15   : > { %922 = vmatpush1.bf16.msra.mxu0 %v921_v25  ;;  %986 = vmatpush1.bf16.msra.mxu1 %v921_v25  ;;  %v949_v5 = vpack.c.bf16 %v288_v2, %v286_v1  ;;  %v951_v6 = vpack.c.bf16 %v293_v4, %v291_v3  ;;  %v290_v7 = vld [vmem:[%s1482_s1 + $0x160] sm:$0xff]  ;;  %v292_v8 = vld [vmem:[%s1482_s1 + $0x170] sm:$0xff]  ;;  %v295_v9 = vld [vmem:[%s1482_s1 + $0x188] sm:$0xff] }
  0x16   : > { %924 = vmatprep.subr.bf16.mxu0 %v923_v26  ;;  %988 = vmatprep.subr.bf16.mxu1 %v923_v26  ;;  %v297_v10 = vld [vmem:[%s1482_s1 + $0x198] sm:$0xff]  ;;  %v953_v11 = vpack.c.bf16 %v292_v8, %v290_v7  ;;  %v294_v13 = vld [vmem:[%s1482_s1 + $0x180] sm:$0xff]  ;;  %v296_v14 = vld [vmem:[%s1482_s1 + $0x190] sm:$0xff] }
  0x17   : > { %v955_v12 = vpack.c.bf16 %v297_v10, %v295_v9  ;;  %v299_v15 = vld [vmem:[%s1482_s1 + $0x1a8] sm:$0xff]  ;;  %v301_v16 = vld [vmem:[%s1482_s1 + $0x1b8] sm:$0xff]  ;;  %v957_v17 = vpack.c.bf16 %v296_v14, %v294_v13  ;;  %v298_v19 = vld [vmem:[%s1482_s1 + $0x1a0] sm:$0xff] }
  0x18   : > { %v959_v18 = vpack.c.bf16 %v301_v16, %v299_v15  ;;  %v300_v20 = vld [vmem:[%s1482_s1 + $0x1b0] sm:$0xff]  ;;  %v303_v21 = vld [vmem:[%s1482_s1 + $0x1c8] sm:$0xff]  ;;  %v305_v22 = vld [vmem:[%s1482_s1 + $0x1d8] sm:$0xff] }
  0x19   : > { %926 = vmatpush1.bf16.msra.mxu0 %v925_v31  ;;  %990 = vmatpush1.bf16.msra.mxu1 %v925_v31  ;;  %v961_v23 = vpack.c.bf16 %v300_v20, %v298_v19  ;;  %v963_v24 = vpack.c.bf16 %v305_v22, %v303_v21  ;;  %v302_v25 = vld [vmem:[%s1482_s1 + $0x1c0] sm:$0xff]  ;;  %v304_v26 = vld [vmem:[%s1482_s1 + $0x1d0] sm:$0xff]  ;;  %v307_v27 = vld [vmem:[%s1482_s1 + $0x1e8] sm:$0xff] }
  0x1a   : > { %928 = vmatprep.subr.bf16.mxu0 %v927_v32  ;;  %992 = vmatprep.subr.bf16.mxu1 %v927_v32  ;;  %v309_v28 = vld [vmem:[%s1482_s1 + $0x1f8] sm:$0xff]  ;;  %v965_v29 = vpack.c.bf16 %v304_v26, %v302_v25  ;;  %v306_v31 = vld [vmem:[%s1482_s1 + $0x1e0] sm:$0xff]  ;;  %v308_v32 = vld [vmem:[%s1482_s1 + $0x1f0] sm:$0xff] }
  0x1b   : > { %v967_v30 = vpack.c.bf16 %v309_v28, %v307_v27  ;;  %v496_v33 = vld [vmem:[%s1484_s3] sm:$0xff]  ;;  %v497_v34 = vld [vmem:[%s1484_s3 + $0x8] sm:$0xff]  ;;  %v498_v40 = vld [vmem:[%s1484_s3 + $0x10] sm:$0xff] }
  0x1c   : > { %v480_v35 = vld [vmem:[%s1483_s2] sm:$0xff]  ;;  %v481_v36 = vld [vmem:[%s1483_s2 + $0x8] sm:$0xff]  ;;  %v1035_v38 = vpack.c.bf16 %v497_v34, %v496_v33  ;;  %v499_v41 = vld [vmem:[%s1484_s3 + $0x18] sm:$0xff] }
  0x1d   : > { %930 = vmatpush1.bf16.msra.mxu0 %v929_v37  ;;  %994 = vmatpush1.bf16.msra.mxu1 %v929_v37  ;;  %v969_v37 = vpack.c.bf16 %v308_v32, %v306_v31  ;;  %v482_v42 = vld [vmem:[%s1483_s2 + $0x10] sm:$0xff]  ;;  %v483_v43 = vld [vmem:[%s1483_s2 + $0x18] sm:$0xff]  ;;  %v242_v44 = vld [vmem:[%s1248_s6] sm:$0xff]  ;;  %v1039_v48 = vpack.c.bf16 %v499_v41, %v498_v40 }
  0x1e   : > { %932 = vmatprep.subr.bf16.mxu0 %v931_v39  ;;  %996 = vmatprep.subr.bf16.mxu1 %v931_v39  ;;  %v1067_v39 = vpack.c.bf16 %v481_v36, %v480_v35  ;;  %v390_v47 = vld [vmem:[%s1248_s6 + $0x38] sm:$0xff]  ;;  %v1071_v49 = vpack.c.bf16 %v483_v43, %v482_v42  ;;  %v500_v50 = vld [vmem:[%s1484_s3 + $0x20] sm:$0xff]  ;;  %v485_v53 = vld [vmem:[%s1483_s2 + $0x28] sm:$0xff] }
  0x1f   : > { %v244_v54 = vld [vmem:[%s1248_s6 + $0x20] sm:$0xff]  ;;  %v389_v55 = vld [vmem:[%s1248_s6 + $0x30] sm:$0xff]  ;;  %v503_v59 = vld [vmem:[%s1484_s3 + $0x38] sm:$0xff] }
  0x20   : > { %v486_v60 = vld [vmem:[%s1483_s2 + $0x30] sm:$0xff]  ;;  %v487_v61 = vld [vmem:[%s1483_s2 + $0x38] sm:$0xff]  ;;  %v505_v1 = vld [vmem:[%s1484_s3 + $0x48] sm:$0xff] }
  0x21   : > { %934 = vmatpush1.bf16.msra.mxu0 %v933_v45  ;;  %998 = vmatpush1.bf16.msra.mxu1 %v933_v45  ;;  %v387_v45 = vld [vmem:[%s1248_s6 + $0x10] sm:$0xff]  ;;  %v488_v2 = vld [vmem:[%s1483_s2 + $0x40] sm:$0xff]  ;;  %v489_v3 = vld [vmem:[%s1483_s2 + $0x48] sm:$0xff] }
  0x22   : > { %936 = vmatprep.subr.bf16.mxu0 %v935_v46  ;;  %1000 = vmatprep.subr.bf16.mxu1 %v935_v46  ;;  %v245_v46 = vld [vmem:[%s1248_s6 + $0x28] sm:$0xff]  ;;  %v507_v7 = vld [vmem:[%s1484_s3 + $0x58] sm:$0xff]  ;;  %v490_v8 = vld [vmem:[%s1483_s2 + $0x50] sm:$0xff] }
  0x23   : > { %v491_v9 = vld [vmem:[%s1483_s2 + $0x58] sm:$0xff]  ;;  %v509_v13 = vld [vmem:[%s1484_s3 + $0x68] sm:$0xff]  ;;  %v492_v14 = vld [vmem:[%s1483_s2 + $0x60] sm:$0xff] }
  0x24   : > { %v493_v16 = vld [vmem:[%s1483_s2 + $0x68] sm:$0xff]  ;;  %v511_v19 = vld [vmem:[%s1484_s3 + $0x78] sm:$0xff]  ;;  %v494_v20 = vld [vmem:[%s1483_s2 + $0x70] sm:$0xff] }
  0x25   : > { %938 = vmatpush1.bf16.msra.mxu0 %v937_v51  ;;  %1002 = vmatpush1.bf16.msra.mxu1 %v937_v51  ;;  %v501_v51 = vld [vmem:[%s1484_s3 + $0x28] sm:$0xff]  ;;  %v495_v22 = vld [vmem:[%s1483_s2 + $0x78] sm:$0xff] }
  0x26   : > { %940 = vmatprep.subr.bf16.mxu0 %v939_v52  ;;  %1004 = vmatprep.subr.bf16.mxu1 %v939_v52  ;;  %v484_v52 = vld [vmem:[%s1483_s2 + $0x20] sm:$0xff]  ;;  %v1043_v56 = vpack.c.bf16 %v501_v51, %v500_v50 }
  0x29   : > { %942 = vmatpush1.bf16.msra.mxu0 %v941_v57  ;;  %1006 = vmatpush1.bf16.msra.mxu1 %v941_v57  ;;  %v1075_v57 = vpack.c.bf16 %v485_v53, %v484_v52  ;;  %v676_v52 = vstv %s797_s22 }
  0x2a   : > { %944 = vmatprep.subr.bf16.mxu0 %v943_v58  ;;  %1008 = vmatprep.subr.bf16.mxu1 %v943_v58  ;;  %v502_v58 = vld [vmem:[%s1484_s3 + $0x30] sm:$0xff] }
  0x2b   : > { %v1047_v62 = vpack.c.bf16 %v503_v59, %v502_v58 }
  0x2d   : > { %946 = vmatpush1.bf16.msra.mxu0 %v945_v63  ;;  %1010 = vmatpush1.bf16.msra.mxu1 %v945_v63  ;;  %v1079_v63 = vpack.c.bf16 %v487_v61, %v486_v60  ;;  %v1122_v60 = vmov 0  }
  0x2e   : > { %948 = vmatprep.subr.bf16.mxu0 %v947_v0  ;;  %1012 = vmatprep.subr.bf16.mxu1 %v947_v0  ;;  %v504_v0 = vld [vmem:[%s1484_s3 + $0x40] sm:$0xff] }
  0x2f   : > { %v1051_v4 = vpack.c.bf16 %v505_v1, %v504_v0 }
  0x31   : > { %950 = vmatpush1.bf16.msra.mxu0 %v949_v5  ;;  %1014 = vmatpush1.bf16.msra.mxu1 %v949_v5  ;;  %v1083_v5 = vpack.c.bf16 %v489_v3, %v488_v2 }
  0x32   : > { %952 = vmatprep.subr.bf16.mxu0 %v951_v6  ;;  %1016 = vmatprep.subr.bf16.mxu1 %v951_v6  ;;  %v506_v6 = vld [vmem:[%s1484_s3 + $0x50] sm:$0xff] }
  0x33   : > { %v1055_v10 = vpack.c.bf16 %v507_v7, %v506_v6 }
  0x35   : > { %954 = vmatpush1.bf16.msra.mxu0 %v953_v11  ;;  %1018 = vmatpush1.bf16.msra.mxu1 %v953_v11  ;;  %v1087_v11 = vpack.c.bf16 %v491_v9, %v490_v8 }
  0x36   : > { %956 = vmatprep.subr.bf16.mxu0 %v955_v12  ;;  %1020 = vmatprep.subr.bf16.mxu1 %v955_v12  ;;  %v508_v12 = vld [vmem:[%s1484_s3 + $0x60] sm:$0xff] }
  0x37   : > { %v1059_v15 = vpack.c.bf16 %v509_v13, %v508_v12 }
  0x39   : > { %958 = vmatpush1.bf16.msra.mxu0 %v957_v17  ;;  %1022 = vmatpush1.bf16.msra.mxu1 %v957_v17  ;;  %v1091_v17 = vpack.c.bf16 %v493_v16, %v492_v14 }
  0x3a   : > { %960 = vmatprep.subr.bf16.mxu0 %v959_v18  ;;  %1024 = vmatprep.subr.bf16.mxu1 %v959_v18  ;;  %v510_v18 = vld [vmem:[%s1484_s3 + $0x70] sm:$0xff] }
  0x3b   : > { %v1063_v21 = vpack.c.bf16 %v511_v19, %v510_v18 }
  0x3d   : > { %962 = vmatpush1.bf16.msra.mxu0 %v961_v23  ;;  %1026 = vmatpush1.bf16.msra.mxu1 %v961_v23  ;;  %v1095_v23 = vpack.c.bf16 %v495_v22, %v494_v20 }
  0x3e   : > { %964 = vmatprep.subr.bf16.mxu0 %v963_v24  ;;  %1028 = vmatprep.subr.bf16.mxu1 %v963_v24 }
  0x41   : > { %966 = vmatpush1.bf16.msra.mxu0 %v965_v29  ;;  %1030 = vmatpush1.bf16.msra.mxu1 %v965_v29 }
  0x42   : > { %968 = vmatprep.subr.bf16.mxu0 %v967_v30  ;;  %1032 = vmatprep.subr.bf16.mxu1 %v967_v30 }
  0x45   : > { %970 = vmatpush1.bf16.msra.mxu0 %v969_v37  ;;  %1034 = vmatpush1.bf16.msra.mxu1 %v969_v37 }
  0x46   : > { %1036 = vmatprep.subr.bf16.mxu1 %v1035_v38  ;;  %1068 = vmatprep.subr.bf16.mxu0 %v1067_v39 }
  0x48   : > { %375 = vmatmul.mubr.f32.vlgmr.msra.gmra.mrb[0].mxu0 %v242_v44  ;;  %456 = vmatmul.mubr.f32.vlgmr.msra.gmra.mrb[0].mxu1 %v387_v45  ;;  %v672_v44 = vlaneseq }
  0x49   : > { %380 = vmatprep.mubr.f32.mxu0 %v245_v46  ;;  %461 = vmatprep.mubr.f32.mxu1 %v390_v47 }
  0x4a   : > { %1038 = vmatpush3.bf16.msra.mxu1 %v1035_v38  ;;  %1070 = vmatpush3.bf16.msra.mxu0 %v1067_v39  ;;  %v673_v45 = vshrl.u32 %v672_v44, 7 }
  0x4b   : > { %1040 = vmatprep.subr.bf16.mxu1 %v1039_v48  ;;  %1072 = vmatprep.subr.bf16.mxu0 %v1071_v49 }
  0x4c   : > { %381 = vmatmul.mubr.f32.gmra.mrb[2].mxu0 %v244_v54  ;;  %462 = vmatmul.mubr.f32.gmra.mrb[2].mxu1 %v389_v55  ;;  %v680_v55 = vand.u32 127, %v672_v44  ;;  %v677_v58 = vadd.s32 %v676_v52, %v673_v45 }
  0x4e   : > { %1042 = vmatpush3.bf16.msra.mxu1 %v1039_v48  ;;  %1074 = vmatpush3.bf16.msra.mxu0 %v1071_v49  ;;  %v674_v49 = vadd.s32 8, %v673_v45  ;;  %vm683_vm0 = vcmp.ge.s32.totalorder %v680_v55, 64 }
  0x4f   : > { %1044 = vmatprep.subr.bf16.mxu1 %v1043_v56  ;;  %1076 = vmatprep.subr.bf16.mxu0 %v1075_v57  ;;  %v684_v61 = vsel %vm683_vm0, 1, %v1122_v60 }
  0x52   : > { %1046 = vmatpush3.bf16.msra.mxu1 %v1043_v56  ;;  %1078 = vmatpush3.bf16.msra.mxu0 %v1075_v57  ;;  %v678_v57 = vadd.s32 %v676_v52, %v674_v49 }
  0x53   : > { %1048 = vmatprep.subr.bf16.mxu1 %v1047_v62  ;;  %1080 = vmatprep.subr.bf16.mxu0 %v1079_v63 }
  0x54   : > { %v682_v59 = vmul.u32 2, %v678_v57 }
  0x56   : > { %1050 = vmatpush3.bf16.msra.mxu1 %v1047_v62  ;;  %1082 = vmatpush3.bf16.msra.mxu0 %v1079_v63  ;;  %v681_v62 = vmul.u32 2, %v677_v58  ;;  %v686_v63 = vadd.s32 %v684_v61, %v682_v59 }
  0x57   : > { %1052 = vmatprep.subr.bf16.mxu1 %v1051_v4  ;;  %1084 = vmatprep.subr.bf16.mxu0 %v1083_v5 }
  0x58   : > { %v685_v0 = vadd.s32 %v684_v61, %v681_v62  ;;  %vm688_vm1 = vcmp.lt.s32.totalorder %v686_v63, 34 }
  0x5a   : > { %1054 = vmatpush3.bf16.msra.mxu1 %v1051_v4  ;;  %1086 = vmatpush3.bf16.msra.mxu0 %v1083_v5  ;;  %vm687_vm2 = vcmp.lt.s32.totalorder %v685_v0, 34 }
  0x5b   : > { %1056 = vmatprep.subr.bf16.mxu1 %v1055_v10  ;;  %1088 = vmatprep.subr.bf16.mxu0 %v1087_v11 }
  0x5e   : > { %1058 = vmatpush3.bf16.msra.mxu1 %v1055_v10  ;;  %1090 = vmatpush3.bf16.msra.mxu0 %v1087_v11 }
  0x5f   : > { %1060 = vmatprep.subr.bf16.mxu1 %v1059_v15  ;;  %1092 = vmatprep.subr.bf16.mxu0 %v1091_v17 }
  0x62   : > { %1062 = vmatpush3.bf16.msra.mxu1 %v1059_v15  ;;  %1094 = vmatpush3.bf16.msra.mxu0 %v1091_v17 }
  0x63   : > { %1064 = vmatprep.subr.bf16.mxu1 %v1063_v21  ;;  %1096 = vmatprep.subr.bf16.mxu0 %v1095_v23 }
  0x66   : > { %1066 = vmatpush3.bf16.msra.mxu1 %v1063_v21  ;;  %1098 = vmatpush3.bf16.msra.mxu0 %v1095_v23 }
 0x11b   : > { %v376_v24 = vpop.f32.mrb[0].mxu0  ;;  %v457_v25 = vpop.f32.mrb[0].mxu1 }
 0x11c   : > { %v468_v26 = vmul.f32 %v376_v24, %v376_v24  ;;  %v474_v27 = vmul.f32 %v457_v25, %v457_v25  ;;  %v378_v28 = vpop.f32.mrb[1].mxu0  ;;  %v459_v29 = vpop.f32.mrb[1].mxu1 }
 0x11d   : > { %v470_v30 = vmul.f32 %v378_v28, %v378_v28  ;;  %v476_v31 = vmul.f32 %v459_v29, %v459_v29 }
 0x11f   : > { %v472_v32 = vadd.f32 %v470_v30, %v468_v26  ;;  %v478_v33 = vadd.f32 %v476_v31, %v474_v27  ;;  %v382_v34 = vpop.f32.mrb[2].mxu0  ;;  %v463_v35 = vpop.f32.mrb[2].mxu1 }
 0x120   : > { %v469_v36 = vmul.f32 %v382_v34, %v382_v34  ;;  %v475_v37 = vmul.f32 %v463_v35, %v463_v35  ;;  %v384_v38 = vpop.f32.mrb[3].mxu0  ;;  %v465_v39 = vpop.f32.mrb[3].mxu1 }
 0x121   : > { %v471_v40 = vmul.f32 %v384_v38, %v384_v38  ;;  %v477_v41 = vmul.f32 %v465_v39, %v465_v39  ;;  %869 = vmatprep.mubr.f32.mxu1 %v478_v33  ;;  %904 = vmatprep.mubr.f32.mxu0 %v472_v32 }
 0x123   : > { %v473_v42 = vadd.f32 %v471_v40, %v469_v36  ;;  %v479_v43 = vadd.f32 %v477_v41, %v475_v37 }
 0x125   : > { %870 = vmatmul.mubr.f32.vlgmr.msra.gmra.mrb[4].mxu1 %v479_v43  ;;  %905 = vmatmul.mubr.f32.vlgmr.msra.gmra.mrb[4].mxu0 %v473_v42 }
 0x1f8   : > { %v871_v46 = vpop.f32.mrb[4].mxu1  ;;  %v906_v47 = vpop.f32.mrb[4].mxu0 }
 0x1f9   : > { %v659_v48 = vadd.f32 %v906_v47, %v871_v46  ;;  %v578_v50 = vpop.f32.mrb[5].mxu1  ;;  %v653_v51 = vpop.f32.mrb[5].mxu0 }
 0x1fa   : > { %v654_v53 = vadd.f32 %v653_v51, %v578_v50 }
 0x1fb   : > { %v663_v54 = vmax.f32 %v659_v48, 1e-10 }
 0x1fc   : > { %v662_v56 = vmax.f32 %v654_v53, 1e-10 }
 0x1fd   : > { %1110 = vlog2.f32 %v663_v54 }
 0x1fe   : > { %1112 = vlog2.f32 %v662_v56 }
 0x207   : > { %v1111_v1 = vpop.eup %1110 }
 0x208   : > { %v1113_v2 = vpop.eup %1112  ;;  %v667_v3 = vmul.f32 0.6931472, %v1111_v1 }
 0x209   : > { %v665_v4 = vmul.f32 0.6931472, %v1113_v2 }
 0x20a   : > { %v669_v5 = vmul.f32 4.342923, %v667_v3 }
 0x20b   : > { %v668_v6 = vmul.f32 4.342923, %v665_v4 }
 0x20c   : > { %v690_v7 = vsel %vm688_vm1, %v669_v5, -inf  ;;  %671 = vst [vmem:[%s236_s26 + $0x8] sm:$0xff] %v669_v5 }
 0x20d   : > { %670 = vst [vmem:[%s236_s26] sm:$0xff] %v668_v6  ;;  %v689_v8 = vsel %vm687_vm2, %v668_v6, -inf }
 0x20e   : > { %v691_v9 = vmax.f32 %v689_v8, %v690_v7 }
 0x210   : > { %v692_v10 = vrot.slane %v691_v9, 4 }
 0x212   : > { %v693_v11 = vmax.f32 %v691_v9, %v692_v10 }
 0x214   : > { %v694_v12 = vrot.slane %v693_v11, 2 }
 0x216   : > { %v695_v13 = vmax.f32 %v693_v11, %v694_v12 }
 0x218   : > { %v696_v14 = vrot.slane %v695_v13, 1 }
 0x21a   : > { %v697_v15 = vmax.f32 %v695_v13, %v696_v14 }
 0x21c   : > { %698 = vst [vmem:[%s241_s29] sm:$0xff] %v697_v15 }
 0x21d PF: > { %s16_s18 = sadd.s32 1, %s1120_s18  }
 0x21e   : > { %p13_p5 = scmp.ge.s32.totalorder %s16_s18, 4  }
 0x220   :  { %15 = sbr.rel (!%p13_p5) target bundleno = 1 (0x1), region = 78 }

</bundles_post_ra>
